<compile_context>
chip_gen: v6e
topology: v6e:2x2x1
jax: 0.10.0
libtpu: 0.0.40
codegen_flags: <defaults>
</compile_context>

<pallas_src>
import functools
import math

import jax
import jax.numpy as jnp
from jax.experimental import pallas as pl
from jax.experimental.pallas import tpu as pltpu


def _round_up(x: int, m: int) -> int:
    return ((x + m - 1) // m) * m


def _cdiv(a: int, b: int) -> int:
    return (a + b - 1) // b


# --------------------------------------------------------------------------- #
# Kernel
# --------------------------------------------------------------------------- #
def _reverse_dense_kernel(x_ref, w_ref, b_ref, o_ref, *, bf16_compute: bool):
    k = pl.program_id(2)

    @pl.when(k == 0)
    def _():
        # Fold the bias into the accumulator init: no scratch, no epilogue add.
        o_ref[...] = jnp.broadcast_to(b_ref[...], o_ref.shape)

    # ReLU in f32 on the VPU (v5e has no bf16 VPU), then feed the MXU.
    h = jnp.maximum(x_ref[...], 0.0)
    if bf16_compute:
        # bf16 inputs, f32 accumulation on the MXU (bf16-native on all gens).
        o_ref[...] += jnp.dot(h.astype(jnp.bfloat16), w_ref[...],
                              preferred_element_type=jnp.float32)
    else:
        # f32 parity mode (matches the PyTorch f32 module).
        o_ref[...] += jnp.dot(h, w_ref[...],
                              preferred_element_type=jnp.float32,
                              precision=jax.lax.Precision.HIGHEST)


# --------------------------------------------------------------------------- #
# Parameter preparation (hoist the W transpose / pad / cast out of the hot path)
# --------------------------------------------------------------------------- #
def prepare_reverse_dense(w: jax.Array, b: jax.Array, *,
                          tn: int = 512, tk: int = 512,
                          precision: str = "bf16") -> dict:
    """Pre-transpose/pad/cast the static parameters ONCE.

    w: (N, K) in nn.Linear layout, b: (N,).  Returns params for
    reverse_dense_prepared(); for repeated calls this avoids an extra full HBM
    pass over W on every invocation.
    """
    assert precision in ("bf16", "f32")
    N, K = w.shape
    assert b.shape == (N,)

    tn = min(tn, _round_up(N, 128))
    tk = min(tk, _round_up(K, 128))
    Np, Kp = _round_up(N, tn), _round_up(K, tk)

    w_dtype = jnp.bfloat16 if precision == "bf16" else jnp.float32
    w_t = w.T.astype(w_dtype)                      # (K, N): lane-major N for the MXU
    if (Kp, Np) != (K, N):
        # zero pad is exact: padded K rows multiply ReLU(0)=0 / padded x cols of 0
        w_t = jnp.pad(w_t, ((0, Kp - K), (0, Np - N)))
    b2 = b.reshape(1, N).astype(jnp.float32)
    if Np != N:
        b2 = jnp.pad(b2, ((0, 0), (0, Np - N)))

    return dict(w=w_t, b=b2, N=N, K=K, tn=tn, tk=tk, precision=precision)


# --------------------------------------------------------------------------- #
# Apply
# --------------------------------------------------------------------------- #
def reverse_dense_prepared(x: jax.Array, params: dict, *, tm: int = 512) -> jax.Array:
    M, K = x.shape
    assert K == params["K"], "weight/input feature mismatch"
    N, tn, tk = params["N"], params["tn"], params["tk"]
    precision = params["precision"]
    w_p, b_p = params["w"], params["b"]
    Kp, Np = w_p.shape

    bf16_compute = precision == "bf16"
    sub_m = 16 if bf16_compute else 8             # bf16 min tile is (16, 128)

    tm = min(tm, _round_up(M, sub_m))
    # v7x has 2 TensorCores and the i/j axes are "parallel": make sure there are
    # at least 2 output tiles when the shape allows, else one core idles.
    while _cdiv(M, tm) * _cdiv(Np, tn) < 2:
        if tn >= 256 and (tn // 2) % 128 == 0:
            tn //= 2                               # still divides Np (Np % tn_old == 0)
        elif tm >= 2 * sub_m and (tm // 2) % sub_m == 0:
            tm //= 2
        else:
            break

    Mp = _round_up(M, tm)
    x_p = x if (Mp, Kp) == (M, K) else jnp.pad(x, ((0, Mp - M), (0, Kp - K)))

    grid = (Mp // tm, Np // tn, Kp // tk)
    gm, gn, _ = grid
    w_item = 2 if bf16_compute else 4

    # Double-buffered working set + headroom; cap at v7x's 64 MiB physical VMEM.
    working = 2 * (tm * tk * 4 + tk * tn * w_item + tn * 4 + tm * tn * 4)
    vmem_limit = int(min(max(2 * working, 32 << 20), 64 << 20))

    kernel = functools.partial(_reverse_dense_kernel, bf16_compute=bf16_compute)

    out = pl.pallas_call(
        kernel,
        out_shape=jax.ShapeDtypeStruct((Mp, Np), jnp.float32),
        grid_spec=pltpu.PrefetchScalarGridSpec(
            num_scalar_prefetch=0,
            grid=grid,
            in_specs=[
                pl.BlockSpec((tm, tk), lambda i, j, k: (i, k)),   # x tile (f32)
                pl.BlockSpec((tk, tn), lambda i, j, k: (k, j)),   # W^T tile (bf16/f32)
                pl.BlockSpec((1, tn), lambda i, j, k: (0, j)),    # bias tile
            ],
            out_specs=pl.BlockSpec((tm, tn), lambda i, j, k: (i, j)),
        ),
        compiler_params=pltpu.CompilerParams(
            dimension_semantics=("parallel", "parallel", "arbitrary"),
            vmem_limit_bytes=vmem_limit),
        cost_estimate=pl.CostEstimate(
            flops=2 * Mp * Np * Kp,
            transcendentals=0,
            # honest HBM traffic: x streamed once per N-tile, W once per M-tile
            bytes_accessed=4 * Mp * Kp * gn + w_item * Kp * Np * gm + 4 * Mp * Np),
    )(x_p, w_p, b_p)

    if (Mp, Np) != (M, N):
        out = out[:M, :N]
    return out.astype(x.dtype)


def reverse_dense(x: jax.Array, w: jax.Array, b: jax.Array, *,
                  tm: int = 512, tn: int = 512, tk: int = 512,
                  precision: str = "bf16") -> jax.Array:
    """One-shot convenience: ReLU(x) @ w.T + b.

    For hot loops, call prepare_reverse_dense() once and reuse the params with
    reverse_dense_prepared() so W is not transposed/padded/cast every call.
    """
    params = prepare_reverse_dense(w, b, tn=tn, tk=tk, precision=precision)
    return reverse_dense_prepared(x, params, tm=tm)


# --------------------------------------------------------------------------- #
# Parameter init matching the PyTorch module (kaiming_uniform_, relu gain)
# --------------------------------------------------------------------------- #
def init_params(key, input_size: int, output_size: int):
    kw, kb = jax.random.split(key)
    gain = math.sqrt(2.0)                          # ReLU gain
    bound_w = gain * math.sqrt(3.0 / input_size)
    w = jax.random.uniform(kw, (output_size, input_size), jnp.float32,
                           minval=-bound_w, maxval=bound_w)
    # bias init via kaiming_uniform_(bias[None]) -> fan_in = output_size
    bound_b = gain * math.sqrt(3.0 / output_size)
    b = jax.random.uniform(kb, (output_size,), jnp.float32,
                           minval=-bound_b, maxval=bound_b)
    return w, b


if __name__ == "__main__":
    key = jax.random.PRNGKey(0)
    kx, kp, kx2, kp2, kx3, kp3 = jax.random.split(key, 6)

    # ---- test 1: tiny shape, f32 parity mode --------------------------------
    batch, input_size, output_size = 8, 32, 16
    x = jax.random.normal(kx, (batch, input_size), jnp.float32)
    w, b = init_params(kp, input_size, output_size)
    y = reverse_dense(x, w, b, precision="f32")
    jax.block_until_ready(y)
    y_ref = jnp.dot(jnp.maximum(x, 0.0), w.T,
                    precision=jax.lax.Precision.HIGHEST) + b
    assert y.shape == (batch, output_size)
    assert jnp.allclose(y, y_ref, atol=1e-5, rtol=1e-5), "mismatch vs f32 reference"

    # ---- test 2: non-multiple shapes, bf16 MXU path, hoisted weight prep ----
    M2, K2, N2 = 300, 400, 200
    x2 = jax.random.normal(kx2, (M2, K2), jnp.float32)
    w2, b2 = init_params(kp2, K2, N2)
    params2 = prepare_reverse_dense(w2, b2, precision="bf16")   # prepared once
    y2 = reverse_dense_prepared(x2, params2)
    jax.block_until_ready(y2)
    y2_ref = jnp.dot(jnp.maximum(x2, 0.0).astype(jnp.bfloat16),
                     w2.T.astype(jnp.bfloat16),
                     preferred_element_type=jnp.float32) + b2
    assert jnp.allclose(y2, y2_ref, atol=2e-3, rtol=2e-3), "mismatch vs bf16 reference"

    # ---- test 3: shape where the dual-TC occupancy split kicks in -----------
    M3, K3, N3 = 64, 256, 512
    x3 = jax.random.normal(kx3, (M3, K3), jnp.float32)
    w3, b3 = init_params(kp3, K3, N3)
    y3 = reverse_dense(x3, w3, b3, precision="bf16")
    jax.block_until_ready(y3)
    y3_ref = jnp.dot(jnp.maximum(x3, 0.0).astype(jnp.bfloat16),
                     w3.T.astype(jnp.bfloat16),
                     preferred_element_type=jnp.float32) + b3
    assert jnp.allclose(y3, y3_ref, atol=2e-3, rtol=2e-3), "mismatch vs bf16 reference"

    print("KERNEL_OK")
</pallas_src>

<mosaic_0001>
module attributes {stable_mosaic.version = 11 : i64} {
  func.func @_reverse_dense_kernel(%arg0: i32, %arg1: i32, %arg2: i32, %arg3: memref<8x128xf32, #tpu.memory_space<vmem>>, %arg4: memref<128x128xf32, #tpu.memory_space<vmem>>, %arg5: memref<1x128xf32, #tpu.memory_space<vmem>>, %arg6: memref<8x128xf32, #tpu.memory_space<vmem>>) attributes {dimension_semantics = [#tpu.dimension_semantics<parallel>, #tpu.dimension_semantics<parallel>, #tpu.dimension_semantics<arbitrary>], iteration_bounds = array<i64: 1, 1, 1>, scalar_prefetch = 0 : i64, scratch_operands = 0 : i64, tpu.core_type = #tpu.core_type<tc>, window_params = [{transform_indices = @transform_0, window_bounds = array<i64: 8, 128>}, {transform_indices = @transform_1, window_bounds = array<i64: 128, 128>}, {transform_indices = @transform_2, window_bounds = array<i64: 1, 128>}, {transform_indices = @transform_3, window_bounds = array<i64: 8, 128>}]} {
    %c0_i32 = arith.constant 0 : i32
    %0 = arith.cmpi eq, %arg2, %c0_i32 : i32
    %1 = arith.extui %0 : i1 to i32
    %c0_i32_0 = arith.constant 0 : i32
    %2 = arith.cmpi ne, %1, %c0_i32_0 : i32
    scf.if %2 {
      %c0_9 = arith.constant 0 : index
      %c0_10 = arith.constant 0 : index
      %11 = vector.load %arg5[%c0_9, %c0_10] : memref<1x128xf32, #tpu.memory_space<vmem>>, vector<1x128xf32>
      %12 = vector.shape_cast %11 : vector<1x128xf32> to vector<1x128xf32>
      %13 = vector.broadcast %12 : vector<1x128xf32> to vector<8x128xf32>
      %c0_11 = arith.constant 0 : index
      %c0_12 = arith.constant 0 : index
      %14 = vector.load %arg6[%c0_11, %c0_12] : memref<8x128xf32, #tpu.memory_space<vmem>>, vector<8x128xf32>
      tpu.vector_store %arg6[%c0_11, %c0_12], %13 {strides = array<i32>} : memref<8x128xf32, #tpu.memory_space<vmem>>, vector<8x128xf32>,
    } else {
    }
    %c0 = arith.constant 0 : index
    %c0_1 = arith.constant 0 : index
    %3 = vector.load %arg3[%c0, %c0_1] : memref<8x128xf32, #tpu.memory_space<vmem>>, vector<8x128xf32>
    %cst = arith.constant 0.000000e+00 : f32
    %4 = vector.broadcast %cst : f32 to vector<8x128xf32>
    %5 = arith.maximumf %3, %4 : vector<8x128xf32>
    %c0_2 = arith.constant 0 : index
    %c0_3 = arith.constant 0 : index
    %6 = vector.load %arg6[%c0_2, %c0_3] : memref<8x128xf32, #tpu.memory_space<vmem>>, vector<8x128xf32>
    %c0_4 = arith.constant 0 : index
    %c0_5 = arith.constant 0 : index
    %7 = vector.load %arg4[%c0_4, %c0_5] : memref<128x128xf32, #tpu.memory_space<vmem>>, vector<128x128xf32>
    %cst_6 = arith.constant dense<0.000000e+00> : vector<8x128xf32>
    %8 = tpu.matmul %5, %7, %cst_6 {dimension_numbers = #tpu.dot_dimension_numbers<[1], [0], [0], [1], [0, 0, 1, 1], [], []>, precision = #tpu.contract_precision<fp32>} : vector<8x128xf32>, vector<128x128xf32>, vector<8x128xf32> -> vector<8x128xf32>
    %9 = arith.addf %6, %8 : vector<8x128xf32>
    %c0_7 = arith.constant 0 : index
    %c0_8 = arith.constant 0 : index
    %10 = vector.load %arg6[%c0_7, %c0_8] : memref<8x128xf32, #tpu.memory_space<vmem>>, vector<8x128xf32>
    tpu.vector_store %arg6[%c0_7, %c0_8], %9 {strides = array<i32>} : memref<8x128xf32, #tpu.memory_space<vmem>>, vector<8x128xf32>,
    return
  }
  func.func @transform_0(%arg0: i32, %arg1: i32, %arg2: i32) -> (i32, i32) {
    %c0_i32 = arith.constant 0 : i32
    return %arg0, %arg2 : i32, i32
  }
  func.func @transform_1(%arg0: i32, %arg1: i32, %arg2: i32) -> (i32, i32) {
    %c0_i32 = arith.constant 0 : i32
    return %arg2, %arg1 : i32, i32
  }
  func.func @transform_2(%arg0: i32, %arg1: i32, %arg2: i32) -> (i32, i32) {
    %c0_i32 = arith.constant 0 : i32
    %c0_i32_0 = arith.constant 0 : i32
    return %c0_i32, %arg1 : i32, i32
  }
  func.func @transform_3(%arg0: i32, %arg1: i32, %arg2: i32) -> (i32, i32) {
    %c0_i32 = arith.constant 0 : i32
    return %arg0, %arg1 : i32, i32
  }
}

</mosaic_0001>

<bundles_post_ra>
// kernel: tpu_custom_call.1
= control target key start
LH: loop header
LB: loop body
LE: loop exit
PB: predicated region body
PF: predicated region fallthrough
CT: control target
= control target key end

     0   :  { %8 = vsyncpa [#allocation3], 0  ;;  %s1519_s0 = inlined_call_operand.hbm [shape: f32[8,128], index: 0, kind: input, shape index: {}]   ;;  %s1520_s1 = inlined_call_operand.hbm [shape: f32[128,128], index: 1, kind: input, shape index: {}]   ;;  %s1521_s2 = inlined_call_operand.vmem [shape: f32[1,128], index: 2, kind: input, shape index: {}]   ;;  %s1522_s3 = inlined_call_operand.hbm [shape: f32[8,128], index: 3, kind: output, shape index: {}]  }
   0x1   :  { %9 = vsyncpa [#allocation6], 0 }
   0x2   :  { %10 = vsyncpa [#allocation4], 0  ;;  %s1117_s12 = smov [#allocation2]   ;;  %s1118_s14 = smov [#allocation5]  }
   0x3   :  { %s17_s13 = sshll.u32 %s1117_s12, 4  ;;  %s26_s15 = sshll.u32 %s1118_s14, 4  ;;  %s18_s13 = int_to_ptr.vmem [resolvable:$true] %s17_s13  ;;  %s27_s15 = int_to_ptr.vmem [resolvable:$true] %s26_s15 }
   0x4   :  { %s1059_s16 = scalar_lea.vmem %s18_s13, 128  ;;  %p1064_p1 = scmp.lt.s32.totalorder %s18_s13, %s18_s13 }
   0x5   :  { %p1060_p0 = scmp.ne.s32.totalorder %s18_s13, %s1059_s16  ;;  %p1065_p2 = scmp.lt.s32.totalorder %s1059_s16, %s1059_s16 }
   0x7   :  { %p1066_p3 = por %p1065_p2, %p1064_p1 }
   0x9   :  { %p1067_p4 = pnand %p1066_p3, %p1060_p0 }
   0xb   :  { %1070 = shalt.err (!%p1067_p4)
}
   0xc   :  { %20 = dma.hbm_to_vmem [thread:$0]  %s1519_s0, 128, %s18_s13, [#allocation3]  }
   0xd   :  { %s1079_s19 = scalar_lea.vmem %s27_s15, 2048  ;;  %p1084_p6 = scmp.lt.s32.totalorder %s27_s15, %s27_s15 }
   0xe   :  { %p1080_p5 = scmp.ne.s32.totalorder %s27_s15, %s1079_s19  ;;  %p1085_p7 = scmp.lt.s32.totalorder %s1079_s19, %s1079_s19 }
  0x10   :  { %p1086_p8 = por %p1085_p7, %p1084_p6 }
  0x12   :  { %p1087_p9 = pnand %p1086_p8, %p1080_p5 }
  0x14   :  { %1090 = shalt.err (!%p1087_p9)
}
  0x15   :  { %s1119_s20 = smov 128   ;;  %s1120_s21 = smov 8  }
  0x16   :  { %32 = dma.hbm_to_vmem [thread:$0]  %s1520_s1, 2048, %s27_s15, [#allocation6], %s1119_s20, %s1119_s20, %s1120_s21  }
  0x17   :  { %1111 = dma.done.wait [#allocation3], 128  }
  0x18   :  { %1112 = vsyncadd [#allocation3], 4294967168 }
  0x19   :  { %1113 = dma.done.wait [#allocation6], 2048  }
  0x1a   :  { %1114 = vsyncadd [#allocation6], 4294965248  ;;  %v1121_v0 = vmov 0.0   ;;  %vm1122_vm0 = vmmov 0   ;;  %v71_v1 = vld [vmem:[#allocation5 + $0x78] sm:$0xff]  ;;  %v70_v2 = vld [vmem:[#allocation5 + $0x70] sm:$0xff] }
  0x1b   :  { %834 = vmatprep.subr.mxu0 %v1121_v0  ;;  %869 = vmatprep.subr.mxu1 %v1121_v0  ;;  %v69_v3 = vld [vmem:[#allocation5 + $0x68] sm:$0xff]  ;;  %v1156_v4 = vand.u32 4294901760, %v71_v1  ;;  %v1158_v5 = vand.u32 4294901760, %v70_v2  ;;  %v68_v7 = vld [vmem:[#allocation5 + $0x60] sm:$0xff]  ;;  %v67_v8 = vld [vmem:[#allocation5 + $0x58] sm:$0xff]  ;;  %s1123_s24 = smov [#allocation7]  }
  0x1c   :  { %866 = vmatprep.mubr.msk.f32.mxu0 %vm1122_vm0, %v1121_v0  ;;  %901 = vmatprep.mubr.msk.f32.mxu1 %vm1122_vm0, %v1121_v0  ;;  %v1160_v6 = vand.u32 4294901760, %v69_v3  ;;  %v66_v9 = vld [vmem:[#allocation5 + $0x50] sm:$0xff]  ;;  %v1162_v10 = vand.u32 4294901760, %v68_v7  ;;  %v1164_v11 = vand.u32 4294901760, %v67_v8  ;;  %v65_v13 = vld [vmem:[#allocation5 + $0x48] sm:$0xff]  ;;  %v64_v14 = vld [vmem:[#allocation5 + $0x40] sm:$0xff] }
  0x1d   :  { %v1166_v12 = vand.u32 4294901760, %v66_v9  ;;  %835 = vmatpush3.msra.mxu0 %v1156_v4  ;;  %v1170_v15 = vsub.f32 %v71_v1, %v1156_v4  ;;  %v1173_v16 = vsub.f32 %v70_v2, %v1158_v5  ;;  %v1175_v17 = vand.u32 4294901760, %v65_v13  ;;  %v63_v19 = vld [vmem:[#allocation5 + $0x38] sm:$0xff]  ;;  %v62_v26 = vld [vmem:[#allocation5 + $0x30] sm:$0xff]  ;;  %v61_v34 = vld [vmem:[#allocation5 + $0x28] sm:$0xff]  ;;  %s721_s25 = sshll.u32 %s1123_s24, 4  ;;  %s722_s25 = int_to_ptr.vmem [resolvable:$true] %s721_s25 }
  0x1e   :  { %v1178_v18 = vsub.f32 %v69_v3, %v1160_v6  ;;  %836 = vmatprep.subr.mxu0 %v1121_v0  ;;  %v1182_v20 = vsub.f32 %v68_v7, %v1162_v10  ;;  %v1185_v21 = vsub.f32 %v67_v8, %v1164_v11  ;;  %v1191_v25 = vand.u32 4294901760, %v64_v14  ;;  %v60_v41 = vld [vmem:[#allocation5 + $0x20] sm:$0xff]  ;;  %v53_v48 = vld [vmem:[#allocation2] sm:$0xff]  ;;  %v58_v54 = vld [vmem:[#allocation5 + $0x10] sm:$0xff]  ;;  %s1091_s26 = scalar_lea.vmem %s722_s25, 128  ;;  %p1096_p11 = scmp.lt.s32.totalorder %s722_s25, %s722_s25 }
  0x1f   :  { %837 = vmatpush3.msra.mxu0 %v1158_v5  ;;  %v166_v22 = vand.u32 4294901760, %v1170_v15  ;;  %v173_v23 = vand.u32 4294901760, %v1173_v16  ;;  %v1195_v28 = vand.u32 4294901760, %v63_v19  ;;  %v1199_v30 = vsub.f32 %v66_v9, %v1166_v12  ;;  %v59_v50 = vld [vmem:[#allocation5 + $0x18] sm:$0xff]  ;;  %v57_v61 = vld [vmem:[#allocation5 + $0x8] sm:$0xff]  ;;  %v56_v8 = vld [vmem:[#allocation5] sm:$0xff]  ;;  %p1092_p10 = scmp.ne.s32.totalorder %s722_s25, %s1091_s26  ;;  %p1097_p12 = scmp.lt.s32.totalorder %s1091_s26, %s1091_s26 }
  0x20   :  { %v180_v24 = vand.u32 4294901760, %v1178_v18  ;;  %838 = vmatprep.subr.mxu0 %v1121_v0  ;;  %v187_v27 = vand.u32 4294901760, %v1182_v20  ;;  %v194_v29 = vand.u32 4294901760, %v1185_v21  ;;  %v1212_v35 = vsub.f32 %v65_v13, %v1175_v17 }
  0x21   :  { %839 = vmatpush3.msra.mxu0 %v1160_v6  ;;  %v167_v31 = vsub.f32 %v1170_v15, %v166_v22  ;;  %v174_v32 = vsub.f32 %v1173_v16, %v173_v23  ;;  %v1215_v36 = vand.u32 4294901760, %v62_v26  ;;  %v201_v40 = vand.u32 4294901760, %v1199_v30  ;;  %p1098_p13 = por %p1097_p12, %p1096_p11 }
  0x22   :  { %v181_v33 = vsub.f32 %v1178_v18, %v180_v24  ;;  %840 = vmatprep.subr.mxu0 %v1121_v0  ;;  %v188_v39 = vsub.f32 %v1182_v20, %v187_v27  ;;  %v1223_v42 = vand.u32 4294901760, %v61_v34  ;;  %v1226_v43 = vsub.f32 %v64_v14, %v1191_v25 }
  0x23   :  { %841 = vmatpush3.msra.mxu0 %v1162_v10  ;;  %v168_v37 = vand.u32 4294901760, %v167_v31  ;;  %v175_v38 = vand.u32 4294901760, %v174_v32  ;;  %v195_v45 = vsub.f32 %v1185_v21, %v194_v29  ;;  %v208_v46 = vand.u32 4294901760, %v1212_v35  ;;  %p1099_p0 = pnand %p1098_p13, %p1092_p10 }
  0x24   :  { %842 = vmatprep.subr.mxu0 %v1121_v0  ;;  %v182_v44 = vand.u32 4294901760, %v181_v33  ;;  %v1234_v47 = vsub.f32 %v63_v19, %v1195_v28  ;;  %v1238_v49 = vand.u32 4294901760, %v60_v41  ;;  %v189_v51 = vand.u32 4294901760, %v188_v39 }
  0x25   :  { %843 = vmatpush3.msra.mxu0 %v1164_v11  ;;  %870 = vmatpush3.msra.mxu1 %v168_v37  ;;  %v202_v52 = vsub.f32 %v1199_v30, %v201_v40  ;;  %v215_v53 = vand.u32 4294901760, %v1226_v43  ;;  %v1246_v55 = vsub.f32 %v62_v26, %v1215_v36  ;;  %v54_v57 = vmax.f32 %v53_v48, 0.0 }
  0x26   :  { %844 = vmatprep.subr.mxu0 %v1121_v0  ;;  %871 = vmatprep.subr.mxu1 %v1121_v0  ;;  %v222_v56 = vand.u32 4294901760, %v1234_v47  ;;  %v196_v58 = vand.u32 4294901760, %v195_v45  ;;  %v209_v59 = vsub.f32 %v1212_v35, %v208_v46  ;;  %v1255_v60 = vand.u32 4294901760, %v59_v50 }
  0x27   :  { %845 = vmatpush3.msra.mxu0 %v1166_v12  ;;  %872 = vmatpush3.msra.mxu1 %v175_v38  ;;  %v1258_v62 = vsub.f32 %v61_v34, %v1223_v42  ;;  %v1262_v63 = vand.u32 4294901760, %v58_v54  ;;  %v1264_v1 = vand.u32 4294901760, %v54_v57  ;;  %v203_v2 = vand.u32 4294901760, %v202_v52 }
  0x28   :  { %846 = vmatprep.subr.mxu0 %v1121_v0  ;;  %873 = vmatprep.subr.mxu1 %v1121_v0  ;;  %v216_v3 = vsub.f32 %v1226_v43, %v215_v53  ;;  %v229_v7 = vand.u32 4294901760, %v1246_v55  ;;  %v1272_v9 = vsub.f32 %v60_v41, %v1238_v49  ;;  %v223_v13 = vsub.f32 %v1234_v47, %v222_v56 }
  0x29   :  { %847 = vmatpush3.msra.mxu0 %v1175_v17  ;;  %874 = vmatpush3.msra.mxu1 %v182_v44  ;;  %v1279_v14 = vand.u32 4294901760, %v57_v61  ;;  %v210_v19 = vand.u32 4294901760, %v209_v59  ;;  %v236_v26 = vand.u32 4294901760, %v1258_v62  ;;  %v1284_v31 = vsub.f32 %v54_v57, %v1264_v1 }
  0x2a   :  { %848 = vmatprep.subr.mxu0 %v1121_v0  ;;  %875 = vmatprep.subr.mxu1 %v1121_v0  ;;  %v1287_v32 = vsub.f32 %v59_v50, %v1255_v60  ;;  %v1291_v33 = vand.u32 4294901760, %v56_v8  ;;  %v217_v34 = vand.u32 4294901760, %v216_v3  ;;  %v230_v37 = vsub.f32 %v1246_v55, %v229_v7 }
  0x2b   :  { %849 = vmatpush3.msra.mxu0 %v1191_v25  ;;  %876 = vmatpush3.msra.mxu1 %v189_v51  ;;  %v243_v38 = vand.u32 4294901760, %v1272_v9  ;;  %v1299_v39 = vsub.f32 %v58_v54, %v1262_v63  ;;  %v224_v41 = vand.u32 4294901760, %v223_v13  ;;  %v237_v44 = vsub.f32 %v1258_v62, %v236_v26 }
  0x2c   :  { %850 = vmatprep.subr.mxu0 %v1121_v0  ;;  %877 = vmatprep.subr.mxu1 %v1121_v0  ;;  %v155_v45 = vand.u32 4294901760, %v1284_v31  ;;  %v250_v48 = vand.u32 4294901760, %v1287_v32  ;;  %v1310_v50 = vsub.f32 %v57_v61, %v1279_v14  ;;  %v231_v51 = vand.u32 4294901760, %v230_v37 }
  0x2d   :  { %851 = vmatpush3.msra.mxu0 %v1195_v28  ;;  %878 = vmatpush3.msra.mxu1 %v196_v58  ;;  %v244_v52 = vsub.f32 %v1272_v9, %v243_v38  ;;  %v257_v54 = vand.u32 4294901760, %v1299_v39  ;;  %v1320_v57 = vsub.f32 %v56_v8, %v1291_v33  ;;  %v238_v58 = vand.u32 4294901760, %v237_v44 }
  0x2e   :  { %852 = vmatprep.subr.mxu0 %v1121_v0  ;;  %879 = vmatprep.subr.mxu1 %v1121_v0  ;;  %v156_v59 = vsub.f32 %v1284_v31, %v155_v45  ;;  %v251_v61 = vsub.f32 %v1287_v32, %v250_v48 }
  0x2f   :  { %853 = vmatpush3.msra.mxu0 %v1215_v36  ;;  %880 = vmatpush3.msra.mxu1 %v203_v2  ;;  %v264_v2 = vand.u32 4294901760, %v1310_v50  ;;  %v245_v3 = vand.u32 4294901760, %v244_v52  ;;  %v258_v8 = vsub.f32 %v1299_v39, %v257_v54  ;;  %v271_v13 = vand.u32 4294901760, %v1320_v57 }
  0x30   :  { %854 = vmatprep.subr.mxu0 %v1121_v0  ;;  %881 = vmatprep.subr.mxu1 %v1121_v0 }
  0x31   :  { %855 = vmatpush3.msra.mxu0 %v1223_v42  ;;  %882 = vmatpush3.msra.mxu1 %v210_v19  ;;  %v157_v19 = vand.u32 4294901760, %v156_v59  ;;  %v265_v37 = vsub.f32 %v1310_v50, %v264_v2  ;;  %v272_v44 = vsub.f32 %v1320_v57, %v271_v13 }
  0x32   :  { %856 = vmatprep.subr.mxu0 %v1121_v0  ;;  %883 = vmatprep.subr.mxu1 %v1121_v0 }
  0x33   :  { %857 = vmatpush3.msra.mxu0 %v1238_v49  ;;  %884 = vmatpush3.msra.mxu1 %v217_v34  ;;  %v252_v34 = vand.u32 4294901760, %v251_v61  ;;  %v273_v52 = vand.u32 4294901760, %v272_v44 }
  0x34   :  { %858 = vmatprep.subr.mxu0 %v1121_v0  ;;  %885 = vmatprep.subr.mxu1 %v1121_v0 }
  0x35   :  { %859 = vmatpush3.msra.mxu0 %v1255_v60  ;;  %886 = vmatpush3.msra.mxu1 %v224_v41  ;;  %v259_v41 = vand.u32 4294901760, %v258_v8 }
  0x36   :  { %860 = vmatprep.subr.mxu0 %v1121_v0  ;;  %887 = vmatprep.subr.mxu1 %v1121_v0 }
  0x37   :  { %861 = vmatpush3.msra.mxu0 %v1262_v63  ;;  %888 = vmatpush3.msra.mxu1 %v231_v51  ;;  %v266_v51 = vand.u32 4294901760, %v265_v37 }
  0x38   :  { %862 = vmatprep.subr.mxu0 %v1121_v0  ;;  %889 = vmatprep.subr.mxu1 %v1121_v0 }
  0x39   :  { %863 = vmatpush3.msra.mxu0 %v1279_v14  ;;  %890 = vmatpush3.msra.mxu1 %v238_v58 }
  0x3a   :  { %864 = vmatprep.subr.mxu0 %v1121_v0  ;;  %891 = vmatprep.subr.mxu1 %v1121_v0 }
  0x3b   :  { %865 = vmatpush3.msra.mxu0 %v1291_v33  ;;  %892 = vmatpush3.msra.mxu1 %v245_v3 }
  0x3c   :  { %893 = vmatprep.subr.mxu1 %v1121_v0  ;;  %904 = vmatprep.subr.mxu0 %v1121_v0 }
  0x3d   :  { %867 = vmatmul.mubr.f32.vlgmr.msra.gmra.mxu0 %v157_v19  ;;  %894 = vmatpush3.msra.mxu1 %v252_v34 }
  0x3e   :  { %905 = vmatpush3.msra.mxu0 %v1170_v15  ;;  %895 = vmatprep.subr.mxu1 %v1121_v0 }
  0x3f   :  { %906 = vmatprep.subr.mxu0 %v1121_v0  ;;  %896 = vmatpush3.msra.mxu1 %v259_v41 }
  0x40   :  { %907 = vmatpush3.msra.mxu0 %v1173_v16  ;;  %897 = vmatprep.subr.mxu1 %v1121_v0 }
  0x41   :  { %908 = vmatprep.subr.mxu0 %v1121_v0  ;;  %898 = vmatpush3.msra.mxu1 %v266_v51 }
  0x42   :  { %909 = vmatpush3.msra.mxu0 %v1178_v18  ;;  %899 = vmatprep.subr.mxu1 %v1121_v0 }
  0x43   :  { %910 = vmatprep.subr.mxu0 %v1121_v0  ;;  %900 = vmatpush3.msra.mxu1 %v273_v52 }
  0x44   :  { %911 = vmatpush3.msra.mxu0 %v1182_v20  ;;  %902 = vmatmul.mubr.f32.vlgmr.msra.gmra.mxu1 %v1264_v1 }
  0x45   :  { %912 = vmatprep.subr.mxu0 %v1121_v0  ;;  %939 = vmatprep.subr.mxu1 %v1121_v0 }
  0x46   :  { %913 = vmatpush3.msra.mxu0 %v1185_v21  ;;  %940 = vmatpush3.msra.mxu1 %v1156_v4 }
  0x47   :  { %914 = vmatprep.subr.mxu0 %v1121_v0  ;;  %941 = vmatprep.subr.mxu1 %v1121_v0 }
  0x48   :  { %915 = vmatpush3.msra.mxu0 %v1199_v30  ;;  %942 = vmatpush3.msra.mxu1 %v1158_v5 }
  0x49   :  { %916 = vmatprep.subr.mxu0 %v1121_v0  ;;  %943 = vmatprep.subr.mxu1 %v1121_v0 }
  0x4a   :  { %917 = vmatpush3.msra.mxu0 %v1212_v35  ;;  %944 = vmatpush3.msra.mxu1 %v1160_v6 }
  0x4b   :  { %918 = vmatprep.subr.mxu0 %v1121_v0  ;;  %945 = vmatprep.subr.mxu1 %v1121_v0 }
  0x4c   :  { %919 = vmatpush3.msra.mxu0 %v1226_v43  ;;  %946 = vmatpush3.msra.mxu1 %v1162_v10 }
  0x4d   :  { %920 = vmatprep.subr.mxu0 %v1121_v0  ;;  %947 = vmatprep.subr.mxu1 %v1121_v0 }
  0x4e   :  { %921 = vmatpush3.msra.mxu0 %v1234_v47  ;;  %948 = vmatpush3.msra.mxu1 %v1164_v11 }
  0x4f   :  { %922 = vmatprep.subr.mxu0 %v1121_v0  ;;  %949 = vmatprep.subr.mxu1 %v1121_v0 }
  0x50   :  { %923 = vmatpush3.msra.mxu0 %v1246_v55  ;;  %950 = vmatpush3.msra.mxu1 %v1166_v12 }
  0x51   :  { %924 = vmatprep.subr.mxu0 %v1121_v0  ;;  %951 = vmatprep.subr.mxu1 %v1121_v0 }
  0x52   :  { %925 = vmatpush3.msra.mxu0 %v1258_v62  ;;  %952 = vmatpush3.msra.mxu1 %v1175_v17 }
  0x53   :  { %926 = vmatprep.subr.mxu0 %v1121_v0  ;;  %953 = vmatprep.subr.mxu1 %v1121_v0 }
  0x54   :  { %927 = vmatpush3.msra.mxu0 %v1272_v9  ;;  %954 = vmatpush3.msra.mxu1 %v1191_v25 }
  0x55   :  { %928 = vmatprep.subr.mxu0 %v1121_v0  ;;  %955 = vmatprep.subr.mxu1 %v1121_v0 }
  0x56   :  { %929 = vmatpush3.msra.mxu0 %v1287_v32  ;;  %956 = vmatpush3.msra.mxu1 %v1195_v28 }
  0x57   :  { %930 = vmatprep.subr.mxu0 %v1121_v0  ;;  %957 = vmatprep.subr.mxu1 %v1121_v0 }
  0x58   :  { %931 = vmatpush3.msra.mxu0 %v1299_v39  ;;  %958 = vmatpush3.msra.mxu1 %v1215_v36 }
  0x59   :  { %932 = vmatprep.subr.mxu0 %v1121_v0  ;;  %959 = vmatprep.subr.mxu1 %v1121_v0 }
  0x5a   :  { %933 = vmatpush3.msra.mxu0 %v1310_v50  ;;  %960 = vmatpush3.msra.mxu1 %v1223_v42 }
  0x5b   :  { %934 = vmatprep.subr.mxu0 %v1121_v0  ;;  %961 = vmatprep.subr.mxu1 %v1121_v0 }
  0x5c   :  { %935 = vmatpush3.msra.mxu0 %v1320_v57  ;;  %936 = vmatprep.mubr.msk.f32.mxu0 %vm1122_vm0, %v1121_v0 }
  0x5d   :  { %962 = vmatpush3.msra.mxu1 %v1238_v49  ;;  %937 = vmatmul.mubr.f32.vlgmr.msra.gmra.mxu0 %v1284_v31 }
  0x5e   :  { %963 = vmatprep.subr.mxu1 %v1121_v0  ;;  %974 = vmatprep.subr.mxu0 %v1121_v0 }
  0x5f   :  { %964 = vmatpush3.msra.mxu1 %v1255_v60  ;;  %975 = vmatpush3.msra.mxu0 %v166_v22 }
  0x60   :  { %965 = vmatprep.subr.mxu1 %v1121_v0  ;;  %976 = vmatprep.subr.mxu0 %v1121_v0 }
  0x61   :  { %966 = vmatpush3.msra.mxu1 %v1262_v63  ;;  %977 = vmatpush3.msra.mxu0 %v173_v23 }
  0x62   :  { %967 = vmatprep.subr.mxu1 %v1121_v0  ;;  %978 = vmatprep.subr.mxu0 %v1121_v0 }
  0x63   :  { %968 = vmatpush3.msra.mxu1 %v1279_v14  ;;  %979 = vmatpush3.msra.mxu0 %v180_v24 }
  0x64   :  { %969 = vmatprep.subr.mxu1 %v1121_v0  ;;  %980 = vmatprep.subr.mxu0 %v1121_v0 }
  0x65   :  { %970 = vmatpush3.msra.mxu1 %v1291_v33  ;;  %971 = vmatprep.mubr.msk.f32.mxu1 %vm1122_vm0, %v1121_v0 }
  0x66   :  { %981 = vmatpush3.msra.mxu0 %v187_v27  ;;  %972 = vmatmul.mubr.f32.vlgmr.msra.gmra.mxu1 %v155_v45 }
  0x67   :  { %982 = vmatprep.subr.mxu0 %v1121_v0  ;;  %1009 = vmatprep.subr.mxu1 %v1121_v0 }
  0x68   :  { %983 = vmatpush3.msra.mxu0 %v194_v29  ;;  %1010 = vmatpush3.msra.mxu1 %v1156_v4 }
  0x69   :  { %984 = vmatprep.subr.mxu0 %v1121_v0  ;;  %1011 = vmatprep.subr.mxu1 %v1121_v0 }
  0x6a   :  { %985 = vmatpush3.msra.mxu0 %v201_v40  ;;  %1012 = vmatpush3.msra.mxu1 %v1158_v5 }
  0x6b   :  { %986 = vmatprep.subr.mxu0 %v1121_v0  ;;  %1013 = vmatprep.subr.mxu1 %v1121_v0 }
  0x6c   :  { %987 = vmatpush3.msra.mxu0 %v208_v46  ;;  %1014 = vmatpush3.msra.mxu1 %v1160_v6 }
  0x6d   :  { %988 = vmatprep.subr.mxu0 %v1121_v0  ;;  %1015 = vmatprep.subr.mxu1 %v1121_v0 }
  0x6e   :  { %989 = vmatpush3.msra.mxu0 %v215_v53  ;;  %1016 = vmatpush3.msra.mxu1 %v1162_v10 }
  0x6f   :  { %990 = vmatprep.subr.mxu0 %v1121_v0  ;;  %1017 = vmatprep.subr.mxu1 %v1121_v0 }
  0x70   :  { %991 = vmatpush3.msra.mxu0 %v222_v56  ;;  %1018 = vmatpush3.msra.mxu1 %v1164_v11 }
  0x71   :  { %992 = vmatprep.subr.mxu0 %v1121_v0  ;;  %1019 = vmatprep.subr.mxu1 %v1121_v0 }
  0x72   :  { %993 = vmatpush3.msra.mxu0 %v229_v7  ;;  %1020 = vmatpush3.msra.mxu1 %v1166_v12 }
  0x73   :  { %994 = vmatprep.subr.mxu0 %v1121_v0  ;;  %1021 = vmatprep.subr.mxu1 %v1121_v0 }
  0x74   :  { %995 = vmatpush3.msra.mxu0 %v236_v26  ;;  %1022 = vmatpush3.msra.mxu1 %v1175_v17 }
  0x75   :  { %996 = vmatprep.subr.mxu0 %v1121_v0  ;;  %1023 = vmatprep.subr.mxu1 %v1121_v0 }
  0x76   :  { %997 = vmatpush3.msra.mxu0 %v243_v38  ;;  %1024 = vmatpush3.msra.mxu1 %v1191_v25 }
  0x77   :  { %998 = vmatprep.subr.mxu0 %v1121_v0  ;;  %1025 = vmatprep.subr.mxu1 %v1121_v0 }
  0x78   :  { %999 = vmatpush3.msra.mxu0 %v250_v48  ;;  %1026 = vmatpush3.msra.mxu1 %v1195_v28 }
  0x79   :  { %1000 = vmatprep.subr.mxu0 %v1121_v0  ;;  %1027 = vmatprep.subr.mxu1 %v1121_v0 }
  0x7a   :  { %1001 = vmatpush3.msra.mxu0 %v257_v54  ;;  %1028 = vmatpush3.msra.mxu1 %v1215_v36 }
  0x7b   :  { %1002 = vmatprep.subr.mxu0 %v1121_v0  ;;  %1029 = vmatprep.subr.mxu1 %v1121_v0 }
  0x7c   :  { %1003 = vmatpush3.msra.mxu0 %v264_v2  ;;  %1030 = vmatpush3.msra.mxu1 %v1223_v42 }
  0x7d   :  { %1004 = vmatprep.subr.mxu0 %v1121_v0  ;;  %1031 = vmatprep.subr.mxu1 %v1121_v0 }
  0x7e   :  { %1005 = vmatpush3.msra.mxu0 %v271_v13  ;;  %1006 = vmatprep.mubr.msk.f32.mxu0 %vm1122_vm0, %v1121_v0 }
  0x7f   :  { %1032 = vmatpush3.msra.mxu1 %v1238_v49  ;;  %1007 = vmatmul.mubr.f32.vlgmr.msra.gmra.mxu0 %v1264_v1 }
  0x80   :  { %1033 = vmatprep.subr.mxu1 %v1121_v0  ;;  %1041 = vmatprep.mubr.msk.f32.mxu1 %vm1122_vm0, %v1121_v0 }
  0x81   :  { %1034 = vmatpush3.msra.mxu1 %v1255_v60 }
  0x82   :  { %1035 = vmatprep.subr.mxu1 %v1121_v0 }
  0x83   :  { %1036 = vmatpush3.msra.mxu1 %v1262_v63 }
  0x84   :  { %1037 = vmatprep.subr.mxu1 %v1121_v0 }
  0x85   :  { %1038 = vmatpush3.msra.mxu1 %v1279_v14 }
  0x86   :  { %1039 = vmatprep.subr.mxu1 %v1121_v0  ;;  %v731_v0 = vld [vmem:[%s1521_s2] ss:$0 sm:$0xff] }
  0x87   :  { %1040 = vmatpush3.msra.mxu1 %v1291_v33 }
  0x88   :  { %1042 = vmatmul.mubr.f32.vlgmr.msra.gmra.mxu1 %v1264_v1 }
  0xfd   :  { %v159_v4 = vpop.f32.mrf.mxu0 }
  0xff   :  { %v868_v5 = vpop.f32.mrf.mxu0 }
 0x104   :  { %v310_v6 = vpop.f32.mrf.mxu1 }
 0x105   :  { %v311_v18 = vadd.f32 %v310_v6, %v159_v4 }
 0x106   :  { %v903_v10 = vpop.f32.mrf.mxu1 }
 0x11d   :  { %v414_v11 = vpop.f32.mrf.mxu0 }
 0x11e   :  { %v415_v21 = vadd.f32 %v414_v11, %v311_v18 }
 0x11f   :  { %v938_v12 = vpop.f32.mrf.mxu0 }
 0x126   :  { %v503_v15 = vpop.f32.mrf.mxu1 }
 0x127   :  { %v504_v22 = vadd.f32 %v503_v15, %v415_v21 }
 0x128   :  { %v973_v16 = vpop.f32.mrf.mxu1 }
 0x13f   :  { %v622_v17 = vpop.f32.mrf.mxu0 }
 0x140   :  { %v623_v23 = vadd.f32 %v622_v17, %v504_v22 }
 0x141   :  { %v1008_v20 = vpop.f32.mrf.mxu0 }
 0x148   :  { %v709_v24 = vpop.f32.mrf.mxu1 }
 0x149   :  { %v710_v25 = vadd.f32 %v709_v24, %v623_v23 }
 0x14a   :  { %v1043_v27 = vpop.f32.mrf.mxu1 }
 0x14b   :  { %v713_v28 = vadd.f32 %v731_v0, %v710_v25 }
 0x14d   :  { %714 = vst [vmem:[#allocation7] sm:$0xff] %v713_v28 }
 0x14e   :  { %1102 = shalt.err (!%p1099_p0)
}
 0x14f   :  { %724 = dma.vmem_to_hbm [thread:$0]  %s722_s25, 128, %s1522_s3, [#allocation4]  }
 0x150   :  { %1115 = dma.done.wait [#allocation4], 128  }
 0x151   :  { %1116 = vsyncadd [#allocation4], 4294967168 }
 0x152   :  { %728 = vsyncpa [#allocation3], 1 }
 0x153   :  { %729 = vsyncpa [#allocation6], 1 }
 0x154   :  { %730 = vsyncpa [#allocation4], 1 }

</bundles_post_ra>
